<compile_context>
chip_gen: v7x
topology: tpu7x:2x2x1
jax: 0.10.0
libtpu: 0.0.40
codegen_flags: <defaults>
</compile_context>

<pallas_src>
import math

import jax
import jax.numpy as jnp
from jax.experimental import pallas as pl
from jax.experimental.pallas import tpu as pltpu

_SQRT1_2 = 1.0 / math.sqrt(2.0)


def _exact_gelu(x):
    # Matches torch.nn.functional.gelu (default, erf-based).
    # TODO(synk): switch to tanh-GELU (EUP path) if exact erf parity is ever relaxed.
    return 0.5 * x * (1.0 + jax.lax.erf(x * _SQRT1_2))


def _round_up(a: int, b: int) -> int:
    return -(-a // b) * b


def _make_disc_kernel(n_layer: int):
    def kernel(*refs):
        # refs layout:
        #   refs[0]               : packed x tile     (R, pack*d_model)  native dtype
        #   refs[1 + 2*l]         : block-diag W_l^T  (pack*d_in, pack*d_out) native dtype
        #   refs[2 + 2*l]         : tiled bias b_l    (1, pack*d_out)    f32
        #   refs[1 + 2*n_layer]   : packed class wt   (pack*d_model, pack) native dtype
        #   refs[2 + 2*n_layer]   : class bias        (1,)               f32, SMEM
        #   refs[3 + 2*n_layer]   : out tile          (R, pack)          f32
        x_ref = refs[0]
        wc_ref = refs[1 + 2 * n_layer]
        cb_ref = refs[2 + 2 * n_layer]
        out_ref = refs[3 + 2 * n_layer]

        dt = x_ref.dtype
        h = x_ref[...]
        for layer in range(n_layer):
            w = refs[1 + 2 * layer][...]          # pre-transposed, block-diagonal
            b = refs[2 + 2 * layer][...]          # (1, d_out_eff) f32
            z = jnp.dot(h, w, preferred_element_type=jnp.float32) + b
            h = _exact_gelu(z).astype(dt)         # GELU in f32, matmul operand back to native

        logits = jnp.dot(h, wc_ref[...], preferred_element_type=jnp.float32) + cb_ref[0]
        out_ref[...] = jnp.log(jax.nn.sigmoid(logits) + 1e-10)

    return kernel


def simple_discriminator_forward(x, weights, biases, class_weight, class_bias,
                                 *, tile_m: int = 8192):
    """Run the SimpleDiscriminator forward pass via a Pallas TPU kernel.

    x:            (..., d_model)   -- native dtype (f32 or bf16)
    weights[l]:   (d_out_l, d_in_l)
    biases[l]:    (d_out_l,)
    class_weight: (1, d_model)
    class_bias:   (1,)
    returns:      (..., 1) float32
    """
    n_layer = len(weights)
    lead_shape = x.shape[:-1]
    d_model = x.shape[-1]
    m = 1
    for s in lead_shape:
        m *= int(s)

    # Lane packing factor: pack `pack` independent rows of width d_model into
    # the 128-lane vreg width via block-diagonal weights.  Only valid when
    # every layer is d_model x d_model (n_hidden == 1) and d_model | 128.
    layer_dims = set()
    for w in weights:
        layer_dims.add(int(w.shape[0]))
        layer_dims.add(int(w.shape[1]))
    can_pack = (layer_dims == {d_model}) and (128 % d_model == 0) and (d_model < 128)
    pack = 128 // d_model if can_pack else 1
    d_eff = pack * d_model

    compute_dtype = x.dtype
    x2d = x.reshape(m, d_model)                  # no wrapper upcast: cast stays in-kernel

    # Tile sizing in packed-row units.
    r_total = -(-m // pack)                      # ceil(m / pack)
    r_tile = max(8, min(max(tile_m // pack, 1), _round_up(r_total, 8)))
    r_tile = _round_up(r_tile, 8)
    r_pad = _round_up(r_total, r_tile)
    m_pad = r_pad * pack
    if m_pad != m:
        x2d = jnp.pad(x2d, ((0, m_pad - m), (0, 0)))
    x_packed = x2d.reshape(r_pad, d_eff)         # free row-major reshape (no data movement)
    num_tiles = r_pad // r_tile

    eye = jnp.eye(pack, dtype=jnp.float32)

    args = [x_packed]
    in_specs = [pl.BlockSpec((r_tile, d_eff), lambda i: (i, 0))]
    for w, b in zip(weights, biases):
        # Block-diagonal, pre-transposed weight: group g of lanes maps through W^T.
        wb = jnp.kron(eye, jnp.transpose(w).astype(jnp.float32)).astype(compute_dtype)
        bb = jnp.tile(b.astype(jnp.float32).reshape(1, -1), (1, pack))
        args.append(wb)
        args.append(bb)
        in_specs.append(pl.BlockSpec(wb.shape, lambda i: (0, 0)))   # VMEM-resident across grid
        in_specs.append(pl.BlockSpec(bb.shape, lambda i: (0, 0)))

    # Packed classifier: column g holds class_weight in rows [g*d_model, (g+1)*d_model).
    wc = jnp.kron(eye, class_weight.astype(jnp.float32).reshape(d_model, 1)).astype(compute_dtype)
    cb = class_bias.astype(jnp.float32).reshape(1)
    args.append(wc)
    args.append(cb)
    in_specs.append(pl.BlockSpec(wc.shape, lambda i: (0, 0)))
    in_specs.append(pl.BlockSpec(memory_space=pltpu.MemorySpace.SMEM))  # scalar class bias

    out = pl.pallas_call(
        _make_disc_kernel(n_layer),
        out_shape=jax.ShapeDtypeStruct((r_pad, pack), jnp.float32),
        grid=(num_tiles,),
        in_specs=in_specs,
        out_specs=pl.BlockSpec((r_tile, pack), lambda i: (i, 0)),
        compiler_params=pltpu.CompilerParams(
            dimension_semantics=("parallel",),   # megacore sharding on v7x
        ),
    )(*args)

    # (r_pad, pack) row-major == original row order; slice off padding rows.
    return out.reshape(m_pad)[:m].reshape(lead_shape + (1,))


def init_params(key, d_model: int, n_layer: int, n_hidden: int = 1):
    """Deterministic parameter init matching the module's _reset_parameters."""
    d_hidden = d_model * n_hidden
    weights, biases = [], []
    keys = jax.random.split(key, n_layer + 1)
    for layer in range(n_layer):
        d_in = d_model if layer == 0 else d_hidden
        d_out = d_model if layer == n_layer - 1 else d_hidden
        w = 0.1 * jax.random.normal(keys[layer], (d_out, d_in), dtype=jnp.float32)
        b = jnp.zeros((d_out,), dtype=jnp.float32)
        weights.append(w)
        biases.append(b)
    class_weight = 0.1 * jax.random.normal(keys[-1], (1, d_model), dtype=jnp.float32)
    class_bias = jnp.zeros((1,), dtype=jnp.float32)
    return weights, biases, class_weight, class_bias


def _reference_forward(x, weights, biases, class_weight, class_bias):
    h = x.astype(jnp.float32)
    for w, b in zip(weights, biases):
        h = h @ w.T + b
        h = _exact_gelu(h)
    logits = h @ class_weight.T + class_bias
    return jnp.log(jax.nn.sigmoid(logits) + 1e-10)


if __name__ == "__main__":
    d_model, n_layer, n_hidden = 32, 2, 1
    batch, seq = 2, 8

    key = jax.random.PRNGKey(0)
    k_params, k_x, k_x2, k_x3 = jax.random.split(key, 4)
    weights, biases, class_weight, class_bias = init_params(
        k_params, d_model, n_layer, n_hidden
    )

    # Primary small-shape test (single packed tile, padded rows sliced off).
    x = jax.random.normal(k_x, (batch, seq, d_model), dtype=jnp.float32)
    out = simple_discriminator_forward(x, weights, biases, class_weight, class_bias)
    out = jax.block_until_ready(out)
    ref = _reference_forward(x, weights, biases, class_weight, class_bias)
    assert out.shape == (batch, seq, 1), out.shape
    assert jnp.allclose(out, ref, atol=1e-5, rtol=1e-5), (
        float(jnp.max(jnp.abs(out - ref)))
    )

    # Multi-tile test with a small tile (exercises the row grid + tail padding).
    x2 = jax.random.normal(k_x2, (4, 80, d_model), dtype=jnp.float32)   # M = 320 rows
    out2 = simple_discriminator_forward(
        x2, weights, biases, class_weight, class_bias, tile_m=128
    )
    out2 = jax.block_until_ready(out2)
    ref2 = _reference_forward(x2, weights, biases, class_weight, class_bias)
    assert out2.shape == (4, 80, 1), out2.shape
    assert jnp.allclose(out2, ref2, atol=1e-5, rtol=1e-5), (
        float(jnp.max(jnp.abs(out2 - ref2)))
    )

    # Default-tile test: 8192-row (2048 packed) tiles -> 2 grid steps + tail padding.
    x3 = jax.random.normal(k_x3, (2, 5000, d_model), dtype=jnp.float32)  # M = 10000 rows
    out3 = simple_discriminator_forward(x3, weights, biases, class_weight, class_bias)
    out3 = jax.block_until_ready(out3)
    ref3 = _reference_forward(x3, weights, biases, class_weight, class_bias)
    assert out3.shape == (2, 5000, 1), out3.shape
    assert jnp.allclose(out3, ref3, atol=1e-5, rtol=1e-5), (
        float(jnp.max(jnp.abs(out3 - ref3)))
    )

    print("KERNEL_OK")
</pallas_src>

<mosaic_0001>
module attributes {stable_mosaic.version = 11 : i64} {
  func.func @kernel(%arg0: i32, %arg1: memref<8x128xf32, #tpu.memory_space<vmem>>, %arg2: memref<128x128xf32, #tpu.memory_space<vmem>>, %arg3: memref<1x128xf32, #tpu.memory_space<vmem>>, %arg4: memref<128x128xf32, #tpu.memory_space<vmem>>, %arg5: memref<1x128xf32, #tpu.memory_space<vmem>>, %arg6: memref<128x4xf32, #tpu.memory_space<vmem>>, %arg7: memref<1xf32, #tpu.memory_space<smem>>, %arg8: memref<8x4xf32, #tpu.memory_space<vmem>>) attributes {dimension_semantics = [#tpu.dimension_semantics<parallel>], iteration_bounds = array<i64: 1>, scalar_prefetch = 0 : i64, scratch_operands = 0 : i64, tpu.core_type = #tpu.core_type<tc>, window_params = [{transform_indices = @transform_0, window_bounds = array<i64: 8, 128>}, {pipeline_mode = #tpu.pipeline_mode<synchronous>, transform_indices = @transform_1, window_bounds = array<i64: 128, 128>}, {pipeline_mode = #tpu.pipeline_mode<synchronous>, transform_indices = @transform_2, window_bounds = array<i64: 1, 128>}, {pipeline_mode = #tpu.pipeline_mode<synchronous>, transform_indices = @transform_3, window_bounds = array<i64: 128, 128>}, {pipeline_mode = #tpu.pipeline_mode<synchronous>, transform_indices = @transform_4, window_bounds = array<i64: 1, 128>}, {pipeline_mode = #tpu.pipeline_mode<synchronous>, transform_indices = @transform_5, window_bounds = array<i64: 128, 4>}, {transform_indices = @transform_6, window_bounds = array<i64: 1>}, {transform_indices = @transform_7, window_bounds = array<i64: 8, 4>}]} {
    %c0 = arith.constant 0 : index
    %c0_0 = arith.constant 0 : index
    %0 = vector.load %arg1[%c0, %c0_0] : memref<8x128xf32, #tpu.memory_space<vmem>>, vector<8x128xf32>
    %c0_1 = arith.constant 0 : index
    %c0_2 = arith.constant 0 : index
    %1 = vector.load %arg2[%c0_1, %c0_2] : memref<128x128xf32, #tpu.memory_space<vmem>>, vector<128x128xf32>
    %c0_3 = arith.constant 0 : index
    %c0_4 = arith.constant 0 : index
    %2 = vector.load %arg3[%c0_3, %c0_4] : memref<1x128xf32, #tpu.memory_space<vmem>>, vector<1x128xf32>
    %cst = arith.constant dense<0.000000e+00> : vector<8x128xf32>
    %3 = tpu.matmul %0, %1, %cst {dimension_numbers = #tpu.dot_dimension_numbers<[1], [0], [0], [1], [0, 0, 1, 1], [], []>} : vector<8x128xf32>, vector<128x128xf32>, vector<8x128xf32> -> vector<8x128xf32>
    %4 = vector.broadcast %2 : vector<1x128xf32> to vector<8x128xf32>
    %5 = arith.addf %3, %4 : vector<8x128xf32>
    %cst_5 = arith.constant 5.000000e-01 : f32
    %6 = vector.broadcast %cst_5 : f32 to vector<8x128xf32>
    %7 = arith.mulf %6, %5 : vector<8x128xf32>
    %cst_6 = arith.constant 0.707106769 : f32
    %8 = vector.broadcast %cst_6 : f32 to vector<8x128xf32>
    %9 = arith.mulf %5, %8 : vector<8x128xf32>
    %10 = math.erf %9 : vector<8x128xf32>
    %cst_7 = arith.constant 1.000000e+00 : f32
    %11 = vector.broadcast %cst_7 : f32 to vector<8x128xf32>
    %12 = arith.addf %11, %10 : vector<8x128xf32>
    %13 = arith.mulf %7, %12 : vector<8x128xf32>
    %c0_8 = arith.constant 0 : index
    %c0_9 = arith.constant 0 : index
    %14 = vector.load %arg4[%c0_8, %c0_9] : memref<128x128xf32, #tpu.memory_space<vmem>>, vector<128x128xf32>
    %c0_10 = arith.constant 0 : index
    %c0_11 = arith.constant 0 : index
    %15 = vector.load %arg5[%c0_10, %c0_11] : memref<1x128xf32, #tpu.memory_space<vmem>>, vector<1x128xf32>
    %cst_12 = arith.constant dense<0.000000e+00> : vector<8x128xf32>
    %16 = tpu.matmul %13, %14, %cst_12 {dimension_numbers = #tpu.dot_dimension_numbers<[1], [0], [0], [1], [0, 0, 1, 1], [], []>} : vector<8x128xf32>, vector<128x128xf32>, vector<8x128xf32> -> vector<8x128xf32>
    %17 = vector.broadcast %15 : vector<1x128xf32> to vector<8x128xf32>
    %18 = arith.addf %16, %17 : vector<8x128xf32>
    %cst_13 = arith.constant 5.000000e-01 : f32
    %19 = vector.broadcast %cst_13 : f32 to vector<8x128xf32>
    %20 = arith.mulf %19, %18 : vector<8x128xf32>
    %cst_14 = arith.constant 0.707106769 : f32
    %21 = vector.broadcast %cst_14 : f32 to vector<8x128xf32>
    %22 = arith.mulf %18, %21 : vector<8x128xf32>
    %23 = math.erf %22 : vector<8x128xf32>
    %cst_15 = arith.constant 1.000000e+00 : f32
    %24 = vector.broadcast %cst_15 : f32 to vector<8x128xf32>
    %25 = arith.addf %24, %23 : vector<8x128xf32>
    %26 = arith.mulf %20, %25 : vector<8x128xf32>
    %c0_16 = arith.constant 0 : index
    %c0_17 = arith.constant 0 : index
    %27 = vector.load %arg6[%c0_16, %c0_17] : memref<128x4xf32, #tpu.memory_space<vmem>>, vector<128x4xf32>
    %cst_18 = arith.constant dense<0.000000e+00> : vector<8x4xf32>
    %28 = tpu.matmul %26, %27, %cst_18 {dimension_numbers = #tpu.dot_dimension_numbers<[1], [0], [0], [1], [0, 0, 1, 1], [], []>} : vector<8x128xf32>, vector<128x4xf32>, vector<8x4xf32> -> vector<8x4xf32>
    %c0_19 = arith.constant 0 : index
    %29 = memref.load %arg7[%c0_19] : memref<1xf32, #tpu.memory_space<smem>>
    %30 = vector.broadcast %29 : f32 to vector<8x4xf32>
    %31 = arith.addf %28, %30 : vector<8x4xf32>
    %32 = arith.negf %31 : vector<8x4xf32>
    %33 = math.exp %32 : vector<8x4xf32>
    %cst_20 = arith.constant 1.000000e+00 : f32
    %34 = vector.broadcast %cst_20 : f32 to vector<8x4xf32>
    %35 = arith.addf %34, %33 : vector<8x4xf32>
    %36 = arith.divf %34, %35 : vector<8x4xf32>
    %cst_21 = arith.constant 1.000000e-10 : f32
    %37 = vector.broadcast %cst_21 : f32 to vector<8x4xf32>
    %38 = arith.addf %36, %37 : vector<8x4xf32>
    %39 = math.log %38 : vector<8x4xf32>
    %c0_22 = arith.constant 0 : index
    %c0_23 = arith.constant 0 : index
    %40 = vector.load %arg8[%c0_22, %c0_23] : memref<8x4xf32, #tpu.memory_space<vmem>>, vector<8x4xf32>
    tpu.vector_store %arg8[%c0_22, %c0_23], %39 {strides = array<i32>} : memref<8x4xf32, #tpu.memory_space<vmem>>, vector<8x4xf32>,
    return
  }
  func.func @transform_0(%arg0: i32) -> (i32, i32) {
    %c0_i32 = arith.constant 0 : i32
    %c0_i32_0 = arith.constant 0 : i32
    return %arg0, %c0_i32 : i32, i32
  }
  func.func @transform_1(%arg0: i32) -> (i32, i32) {
    %c0_i32 = arith.constant 0 : i32
    %c0_i32_0 = arith.constant 0 : i32
    %c0_i32_1 = arith.constant 0 : i32
    return %c0_i32, %c0_i32_0 : i32, i32
  }
  func.func @transform_2(%arg0: i32) -> (i32, i32) {
    %c0_i32 = arith.constant 0 : i32
    %c0_i32_0 = arith.constant 0 : i32
    %c0_i32_1 = arith.constant 0 : i32
    return %c0_i32, %c0_i32_0 : i32, i32
  }
  func.func @transform_3(%arg0: i32) -> (i32, i32) {
    %c0_i32 = arith.constant 0 : i32
    %c0_i32_0 = arith.constant 0 : i32
    %c0_i32_1 = arith.constant 0 : i32
    return %c0_i32, %c0_i32_0 : i32, i32
  }
  func.func @transform_4(%arg0: i32) -> (i32, i32) {
    %c0_i32 = arith.constant 0 : i32
    %c0_i32_0 = arith.constant 0 : i32
    %c0_i32_1 = arith.constant 0 : i32
    return %c0_i32, %c0_i32_0 : i32, i32
  }
  func.func @transform_5(%arg0: i32) -> (i32, i32) {
    %c0_i32 = arith.constant 0 : i32
    %c0_i32_0 = arith.constant 0 : i32
    %c0_i32_1 = arith.constant 0 : i32
    return %c0_i32, %c0_i32_0 : i32, i32
  }
  func.func @transform_6(%arg0: i32) -> i32 {
    %c0_i32 = arith.constant 0 : i32
    %c0_i32_0 = arith.constant 0 : i32
    return %c0_i32 : i32
  }
  func.func @transform_7(%arg0: i32) -> (i32, i32) {
    %c0_i32 = arith.constant 0 : i32
    %c0_i32_0 = arith.constant 0 : i32
    return %arg0, %c0_i32 : i32, i32
  }
}

</mosaic_0001>

<bundles_post_ra>
// kernel: tpu_custom_call.1
= control target key start
LH: loop header
LB: loop body
LE: loop exit
PB: predicated region body
PF: predicated region fallthrough
CT: control target
= control target key end

     0   :  { %13 = vsyncpa [#allocation4], 0  ;;  %s613_s24 = smov [#allocation3]   ;;  %s809_s0 = inlined_call_operand.vmem [shape: f32[8,128], index: 0, kind: input, shape index: {}]   ;;  %s810_s1 = inlined_call_operand.vmem [shape: f32[128,128], index: 1, kind: input, shape index: {}]   ;;  %s811_s2 = inlined_call_operand.vmem [shape: f32[1,128], index: 2, kind: input, shape index: {}]   ;;  %s812_s3 = inlined_call_operand.hbm [shape: f32[128,128], index: 3, kind: input, shape index: {}]   ;;  %s813_s4 = inlined_call_operand.vmem [shape: f32[1,128], index: 4, kind: input, shape index: {}]   ;;  %s814_s5 = inlined_call_operand.vmem [shape: f32[128,4], index: 5, kind: input, shape index: {}]   ;;  %s815_s6 = inlined_call_operand.<no memory space> [shape: f32[1], index: 6, kind: input, shape index: {}]   ;;  %s816_s7 = inlined_call_operand.vmem [shape: f32[8,4], index: 7, kind: output, shape index: {}]  }
   0x1   :  { %s25_s25 = sshll.u32 %s613_s24, 4  ;;  %s589_s28 = scalar_lea.hbm %s812_s3, 2048  ;;  %s26_s25 = int_to_ptr.vmem [resolvable:$true] %s25_s25 }
   0x2   :  { %p590_p0 = scmp.ne.s32.totalorder %s812_s3, %s589_s28  ;;  %p593_p1 = scmp.lt.u32.totalorder %s589_s28, %s812_s3 }
   0x4   :  { %p595_p2 = pnand %p593_p1, %p590_p0 }
   0x6   :  { %598 = shalt.err (!%p595_p2)
}
   0x7   :  { %s599_s10 = scalar_lea.vmem %s26_s25, 2048  ;;  %p604_p4 = scmp.lt.s32.totalorder %s26_s25, %s26_s25 }
   0x8   :  { %p600_p3 = scmp.ne.s32.totalorder %s26_s25, %s599_s10  ;;  %p605_p5 = scmp.lt.s32.totalorder %s599_s10, %s599_s10 }
   0xa   :  { %p606_p6 = por %p605_p5, %p604_p4 }
   0xc   :  { %p607_p7 = pnand %p606_p6, %p600_p3 }
   0xe   :  { %610 = shalt.err (!%p607_p7)
}
   0xf   :  { %s614_s11 = smov 128   ;;  %s615_s12 = smov 8  }
  0x10   :  { %31 = dma.hbm_to_vmem [thread:$0]  %s812_s3, 2048, %s26_s25, [#allocation4], %s614_s11, %s614_s11, %s615_s12  }
  0x11   :  { %611 = dma.done.wait [#allocation4], 2048  }
  0x12   :  { %612 = vsyncadd [#allocation4], 4294965248  ;;  %v616_v0 = vmov 0.0|0.0   ;;  %vm617_vm0 = vmmov 0   ;;  %v618_v1 = vmov 0.0   ;;  %v42_v2 = vld [vmem:[%s810_s1] sm:$0xff] }
  0x13   :  { %501 = vmatprep.subr.bf16.mxu0 %v616_v0  ;;  %428 = vmatprep.mubr.msk.f32.mxu0 %vm617_vm0, %v618_v1  ;;  %v43_v3 = vld [vmem:[%s810_s1 + $0x8] sm:$0xff]  ;;  %v44_v4 = vld [vmem:[%s810_s1 + $0x10] sm:$0xff]  ;;  %v45_v6 = vld [vmem:[%s810_s1 + $0x18] sm:$0xff]  ;;  %vm335_vm1 = vcmask 31744  }
  0x14   :  { %525 = vmatprep.subr.bf16.mxu1 %v616_v0  ;;  %463 = vmatprep.mubr.msk.f32.mxu1 %vm617_vm0, %v618_v1  ;;  %v502_v5 = vpack.c.bf16 %v43_v3, %v42_v2  ;;  %v505_v7 = vpack.c.bf16 %v45_v6, %v44_v4  ;;  %v46_v8 = vld [vmem:[%s810_s1 + $0x20] sm:$0xff]  ;;  %v47_v9 = vld [vmem:[%s810_s1 + $0x28] sm:$0xff]  ;;  %v142_v12 = vld [vmem:[#allocation3 + $0x10] sm:$0xff] }
  0x15   :  { %v140_v10 = vld [vmem:[#allocation3] sm:$0xff]  ;;  %v141_v11 = vld [vmem:[#allocation3 + $0x8] sm:$0xff]  ;;  %v143_v13 = vld [vmem:[#allocation3 + $0x18] sm:$0xff]  ;;  %v508_v14 = vpack.c.bf16 %v47_v9, %v46_v8 }
  0x16   :  { %503 = vmatpush3.bf16.msra.mxu0 %v502_v5  ;;  %v526_v15 = vpack.c.bf16 %v141_v11, %v140_v10  ;;  %v48_v16 = vld [vmem:[%s810_s1 + $0x30] sm:$0xff]  ;;  %v49_v17 = vld [vmem:[%s810_s1 + $0x38] sm:$0xff]  ;;  %v529_v18 = vpack.c.bf16 %v143_v13, %v142_v12  ;;  %v144_v19 = vld [vmem:[#allocation3 + $0x20] sm:$0xff] }
  0x17   :  { %504 = vmatprep.subr.bf16.mxu0 %v616_v0  ;;  %v145_v20 = vld [vmem:[#allocation3 + $0x28] sm:$0xff]  ;;  %v511_v21 = vpack.c.bf16 %v49_v17, %v48_v16  ;;  %v50_v22 = vld [vmem:[%s810_s1 + $0x40] sm:$0xff]  ;;  %v52_v26 = vld [vmem:[%s810_s1 + $0x50] sm:$0xff] }
  0x18   :  { %527 = vmatpush3.bf16.msra.mxu1 %v526_v15  ;;  %v51_v23 = vld [vmem:[%s810_s1 + $0x48] sm:$0xff]  ;;  %v532_v24 = vpack.c.bf16 %v145_v20, %v144_v19  ;;  %v53_v27 = vld [vmem:[%s810_s1 + $0x58] sm:$0xff]  ;;  %v54_v29 = vld [vmem:[%s810_s1 + $0x60] sm:$0xff] }
  0x19   :  { %528 = vmatprep.subr.bf16.mxu1 %v616_v0  ;;  %v514_v25 = vpack.c.bf16 %v51_v23, %v50_v22  ;;  %v517_v28 = vpack.c.bf16 %v53_v27, %v52_v26  ;;  %v55_v30 = vld [vmem:[%s810_s1 + $0x68] sm:$0xff]  ;;  %v56_v32 = vld [vmem:[%s810_s1 + $0x70] sm:$0xff]  ;;  %v57_v33 = vld [vmem:[%s810_s1 + $0x78] sm:$0xff] }
  0x1a   :  { %506 = vmatpush3.bf16.msra.mxu0 %v505_v7  ;;  %v520_v31 = vpack.c.bf16 %v55_v30, %v54_v29  ;;  %v523_v34 = vpack.c.bf16 %v57_v33, %v56_v32  ;;  %v41_v35 = vld [vmem:[%s809_s0] sm:$0xff]  ;;  %v146_v36 = vld [vmem:[#allocation3 + $0x30] sm:$0xff]  ;;  %v147_v37 = vld [vmem:[#allocation3 + $0x38] sm:$0xff]  ;;  %v255_v29 = vstv %s815_s6 }
  0x1b   :  { %507 = vmatprep.subr.bf16.mxu0 %v616_v0  ;;  %v535_v38 = vpack.c.bf16 %v147_v37, %v146_v36  ;;  %v148_v39 = vld [vmem:[#allocation3 + $0x40] sm:$0xff]  ;;  %v149_v40 = vld [vmem:[#allocation3 + $0x48] sm:$0xff]  ;;  %v150_v42 = vld [vmem:[#allocation3 + $0x50] sm:$0xff] }
  0x1c   :  { %530 = vmatpush3.bf16.msra.mxu1 %v529_v18  ;;  %v538_v41 = vpack.c.bf16 %v149_v40, %v148_v39  ;;  %v151_v43 = vld [vmem:[#allocation3 + $0x58] sm:$0xff]  ;;  %v152_v45 = vld [vmem:[#allocation3 + $0x60] sm:$0xff]  ;;  %v153_v46 = vld [vmem:[#allocation3 + $0x68] sm:$0xff] }
  0x1d   :  { %531 = vmatprep.subr.bf16.mxu1 %v616_v0  ;;  %v541_v44 = vpack.c.bf16 %v151_v43, %v150_v42  ;;  %v544_v47 = vpack.c.bf16 %v153_v46, %v152_v45  ;;  %v154_v48 = vld [vmem:[#allocation3 + $0x70] sm:$0xff]  ;;  %v155_v49 = vld [vmem:[#allocation3 + $0x78] sm:$0xff]  ;;  %v238_v51 = vld [vmem:[%s814_s5] sm:$0xff] }
  0x1e   :  { %509 = vmatpush3.bf16.msra.mxu0 %v508_v14  ;;  %v547_v50 = vpack.c.bf16 %v155_v49, %v154_v48  ;;  %v239_v52 = vld [vmem:[%s814_s5 + $0x8] sm:$0xff]  ;;  %v240_v53 = vld [vmem:[%s814_s5 + $0x10] sm:$0xff]  ;;  %v241_v55 = vld [vmem:[%s814_s5 + $0x18] sm:$0xff] }
  0x1f   :  { %510 = vmatprep.subr.bf16.mxu0 %v616_v0  ;;  %v550_v54 = vpack.c.bf16 %v239_v52, %v238_v51  ;;  %v553_v56 = vpack.c.bf16 %v241_v55, %v240_v53  ;;  %v242_v57 = vld [vmem:[%s814_s5 + $0x20] sm:$0xff]  ;;  %v243_v58 = vld [vmem:[%s814_s5 + $0x28] sm:$0xff]  ;;  %v244_v6 = vld [vmem:[%s814_s5 + $0x30] sm:$0xff] }
  0x20   :  { %533 = vmatpush3.bf16.msra.mxu1 %v532_v24  ;;  %v556_v59 = vpack.c.bf16 %v243_v58, %v242_v57  ;;  %v342_v60 = vld [vmem:[%s811_s2] ss:$0 sm:$0xff]  ;;  %v245_v7 = vld [vmem:[%s814_s5 + $0x38] sm:$0xff]  ;;  %v247_v10 = vld [vmem:[%s814_s5 + $0x48] sm:$0xff] }
  0x21   :  { %534 = vmatprep.subr.bf16.mxu1 %v616_v0  ;;  %v559_v8 = vpack.c.bf16 %v245_v7, %v244_v6  ;;  %v246_v9 = vld [vmem:[%s814_s5 + $0x40] sm:$0xff]  ;;  %v248_v12 = vld [vmem:[%s814_s5 + $0x50] sm:$0xff]  ;;  %v249_v13 = vld [vmem:[%s814_s5 + $0x58] sm:$0xff] }
  0x22   :  { %512 = vmatpush3.bf16.msra.mxu0 %v511_v21  ;;  %v562_v11 = vpack.c.bf16 %v247_v10, %v246_v9  ;;  %v565_v14 = vpack.c.bf16 %v249_v13, %v248_v12  ;;  %v250_v15 = vld [vmem:[%s814_s5 + $0x60] sm:$0xff]  ;;  %v251_v16 = vld [vmem:[%s814_s5 + $0x68] sm:$0xff]  ;;  %v252_v18 = vld [vmem:[%s814_s5 + $0x70] sm:$0xff] }
  0x23   :  { %513 = vmatprep.subr.bf16.mxu0 %v616_v0  ;;  %v568_v17 = vpack.c.bf16 %v251_v16, %v250_v15  ;;  %v253_v19 = vld [vmem:[%s814_s5 + $0x78] sm:$0xff]  ;;  %v343_v21 = vld [vmem:[%s813_s4] ss:$0 sm:$0xff] }
  0x24   :  { %536 = vmatpush3.bf16.msra.mxu1 %v535_v38  ;;  %v571_v20 = vpack.c.bf16 %v253_v19, %v252_v18 }
  0x25   :  { %537 = vmatprep.subr.bf16.mxu1 %v616_v0 }
  0x26   :  { %515 = vmatpush3.bf16.msra.mxu0 %v514_v25 }
  0x27   :  { %516 = vmatprep.subr.bf16.mxu0 %v616_v0 }
  0x28   :  { %539 = vmatpush3.bf16.msra.mxu1 %v538_v41 }
  0x29   :  { %540 = vmatprep.subr.bf16.mxu1 %v616_v0 }
  0x2a   :  { %518 = vmatpush3.bf16.msra.mxu0 %v517_v28 }
  0x2b   :  { %519 = vmatprep.subr.bf16.mxu0 %v616_v0 }
  0x2c   :  { %542 = vmatpush3.bf16.msra.mxu1 %v541_v44 }
  0x2d   :  { %543 = vmatprep.subr.bf16.mxu1 %v616_v0 }
  0x2e   :  { %521 = vmatpush3.bf16.msra.mxu0 %v520_v31 }
  0x2f   :  { %522 = vmatprep.subr.bf16.mxu0 %v616_v0 }
  0x30   :  { %545 = vmatpush3.bf16.msra.mxu1 %v544_v47 }
  0x31   :  { %546 = vmatprep.subr.bf16.mxu1 %v616_v0 }
  0x32   :  { %524 = vmatpush3.bf16.msra.mxu0 %v523_v34 }
  0x33   :  { %549 = vmatprep.subr.bf16.mxu0 %v616_v0 }
  0x34   :  { %548 = vmatpush3.bf16.msra.mxu1 %v547_v50 }
  0x35   :  { %429 = vmatmul.mubr.f32.vlgmr.msra.gmra.mrb[0].mxu0 %v41_v35 }
  0x36   :  { %498 = vmatprep.mubr.msk.f32.mxu0 %vm617_vm0, %v618_v1  ;;  %551 = vmatpush3.bf16.msra.mxu0 %v550_v54 }
  0x37   :  { %552 = vmatprep.subr.bf16.mxu0 %v616_v0 }
  0x3a   :  { %554 = vmatpush3.bf16.msra.mxu0 %v553_v56 }
  0x3b   :  { %555 = vmatprep.subr.bf16.mxu0 %v616_v0 }
  0x3e   :  { %557 = vmatpush3.bf16.msra.mxu0 %v556_v59 }
  0x3f   :  { %558 = vmatprep.subr.bf16.mxu0 %v616_v0 }
  0x42   :  { %560 = vmatpush3.bf16.msra.mxu0 %v559_v8 }
  0x43   :  { %561 = vmatprep.subr.bf16.mxu0 %v616_v0 }
  0x46   :  { %563 = vmatpush3.bf16.msra.mxu0 %v562_v11 }
  0x47   :  { %564 = vmatprep.subr.bf16.mxu0 %v616_v0 }
  0x4a   :  { %566 = vmatpush3.bf16.msra.mxu0 %v565_v14 }
  0x4b   :  { %567 = vmatprep.subr.bf16.mxu0 %v616_v0 }
  0x4e   :  { %569 = vmatpush3.bf16.msra.mxu0 %v568_v17 }
  0x4f   :  { %570 = vmatprep.subr.bf16.mxu0 %v616_v0 }
  0x52   :  { %572 = vmatpush3.bf16.msra.mxu0 %v571_v20 }
 0x108   :  { %v131_v61 = vpop.f32.mrb[0].mxu0 }
 0x109   :  { %v132_v62 = vadd.f32 %v342_v60, %v131_v61  ;;  %v430_v63 = vpop.f32.mrb[1].mxu0 }
 0x10b   :  { %v136_v1 = vmul.f32 0.70710677, %v132_v62  ;;  %v135_v3 = vmul.f32 0.5, %v132_v62 }
 0x10d   :  { %579 = verf.f32 %v136_v1 }
 0x117   :  { %v580_v2 = vpop.eup %579 }
 0x118   :  { %v138_v4 = vadd.f32 1.0, %v580_v2 }
 0x11a   :  { %v139_v5 = vmul.f32 %v138_v4, %v135_v3 }
 0x11c   :  { %464 = vmatmul.mubr.f32.vlgmr.msra.gmra.mrb[0].mxu1 %v139_v5 }
 0x1ef   :  { %v229_v22 = vpop.f32.mrb[0].mxu1 }
 0x1f0   :  { %v230_v23 = vadd.f32 %v343_v21, %v229_v22  ;;  %v465_v24 = vpop.f32.mrb[1].mxu1 }
 0x1f2   :  { %v234_v25 = vmul.f32 0.70710677, %v230_v23  ;;  %v233_v26 = vmul.f32 0.5, %v230_v23 }
 0x1f4   :  { %581 = verf.f32 %v234_v25 }
 0x1fe   :  { %v582_v0 = vpop.eup %581 }
 0x1ff   :  { %v236_v27 = vadd.f32 1.0, %v582_v0 }
 0x201   :  { %v237_v28 = vmul.f32 %v236_v27, %v233_v26 }
 0x203   :  { %499 = vmatmul.mubr.f32.vlgmr.msra.gmra.mrb[2].mxu0 %v237_v28 }
 0x2d6   :  { %v322_v30 = vpop.f32.mrb[2].mxu0 }
 0x2d7   :  { %v323_v31 = vadd.f32 %v322_v30, %v255_v29  ;;  %v500_v32 = vpop.f32.mrb[3].mxu0 }
 0x2d9   :  { %v344_v33 = vmul.f32 -1.442695, %v323_v31 }
 0x2db   :  { %583 = vpow2.f32 %v344_v33 }
 0x2e5   :  { %v584_v34 = vpop.eup %583 }
 0x2e6   :  { %v329_v35 = vadd.f32 1.0, %v584_v34 }
 0x2e8   :  { %585 = vrcp.f32 %v329_v35 }
 0x2f2   :  { %v586_v36 = vpop.eup %585 }
 0x2f3   :  { %v332_v37 = vadd.f32 1e-10, %v586_v36 }
 0x2f5   :  { %587 = vlog2.f32 %v332_v37 }
 0x2ff   :  { %v588_v38 = vpop.eup %587 }
 0x300   :  { %v334_v39 = vmul.f32 0.6931472, %v588_v38 }
 0x302   :  { %336 = vst.msk [vmem:[%s816_s7] sm:$0xff] %vm335_vm1, %v334_v39 }
 0x303   :  { %341 = vsyncpa [#allocation4], 1 }

</bundles_post_ra>
